<compile_context>
chip_gen: v7x
topology: tpu7x:2x2x1
jax: 0.10.0
libtpu: 0.0.40
codegen_flags: <defaults>
</compile_context>

<pallas_src>
import jax
import jax.numpy as jnp
import numpy as np
from jax import lax
from jax.experimental import pallas as pl
from jax.experimental.pallas import tpu as pltpu

# Problem sizes taken from the PyTorch script.
N, T, D = 1, 10, 3          # batch, sequence length, input dim
M, K = 5, 3                 # hidden dim, output dim

# TPU-padded sizes: batch on sublanes (multiple of 8), features on lanes
# (multiple of 128).  128-deep contraction is MXU-native on all generations.
N_P, D_P, M_P, K_P = 8, 128, 128, 128


def rnn_kernel(x_ref, wih_ref, whh_ref, b_ref, wfc_ref, bfc_ref, out_ref,
               buf_ref):
    """tanh-RNN recurrence with batched bf16 prologue/epilogue MXU matmuls.

    x_ref  : (T*N_P, D_P) bf16   time-major input, flattened (t, batch) rows
    wih_ref: (D_P, M_P)   bf16   W_ih^T (zero padded)
    whh_ref: (M_P, M_P)   bf16   W_hh^T (zero padded)
    b_ref  : (1, M_P)     f32    b_ih + b_hh (zero padded)
    wfc_ref: (M_P, K_P)   bf16   W_fc^T (zero padded)
    bfc_ref: (1, K_P)     f32    b_fc (zero padded)
    out_ref: (T*N_P, K_P) f32
    buf_ref: (T*N_P, M_P) f32    scratch: input projection, overwritten in
                                 place with hidden states as they are produced
    """
    t_steps = x_ref.shape[0] // N_P

    # ---- Prologue: batched input projection — one (80,128)x(128,128) bf16
    # MXU pass, biases folded in (no per-step broadcast-add).  Note: padded
    # batch rows (sublanes 1..7) pick up the bias and carry garbage through
    # the recurrence; this never mixes across sublanes (matmuls contract over
    # lanes only) and the wrapper slices it away.
    buf_ref[...] = (
        jnp.dot(x_ref[...], wih_ref[...], preferred_element_type=jnp.float32)
        + b_ref[...]
    )

    # W_hh^T stays live across the unrolled loop (8 bf16 vregs).
    whh = whh_ref[...]

    # ---- Serial recurrence: minimal dependency chain, fully unrolled
    # (T=10 static) -> one 8-row bf16 MXU pass + f32 add + f32 EUP tanh per
    # step.  Static row offsets (multiples of 8) -> aligned sub-slab access.
    h = jnp.zeros((N_P, M_P), jnp.float32)            # exactly one f32 vreg
    for t in range(t_steps):
        row = t * N_P
        pre = buf_ref[pl.ds(row, N_P), :] + jnp.dot(
            h.astype(jnp.bfloat16), whh, preferred_element_type=jnp.float32)
        h = jnp.tanh(pre)                             # f32 tanh (v5e-safe)
        buf_ref[pl.ds(row, N_P), :] = h               # xproj[t] is dead: reuse

    # ---- Epilogue: batched FC projection + bias, single lane-dense store.
    out_ref[...] = (
        jnp.dot(buf_ref[...].astype(jnp.bfloat16), wfc_ref[...],
                preferred_element_type=jnp.float32)
        + bfc_ref[...]
    )


def prepare_params(w_ih, w_hh, b_ih, b_hh, w_fc, b_fc):
    """Pad / transpose / cast the static parameters ONCE (out of the per-call path)."""
    bf = jnp.bfloat16
    m, d = w_ih.shape
    k = w_fc.shape[0]
    wih_p = jnp.zeros((D_P, M_P), bf).at[:d, :m].set(w_ih.T.astype(bf))
    whh_p = jnp.zeros((M_P, M_P), bf).at[:m, :m].set(w_hh.T.astype(bf))
    b_p = jnp.zeros((1, M_P), jnp.float32).at[0, :m].set(b_ih + b_hh)
    wfc_p = jnp.zeros((M_P, K_P), bf).at[:m, :k].set(w_fc.T.astype(bf))
    bfc_p = jnp.zeros((1, K_P), jnp.float32).at[0, :k].set(b_fc)
    return wih_p, whh_p, b_p, wfc_p, bfc_p


@jax.jit
def simple_rnn_forward(x, wih_p, whh_p, b_p, wfc_p, bfc_p):
    """x: (N, T, D) batch-first f32; params from prepare_params.  Returns (N, T, K)."""
    n, t, d = x.shape

    # Single fused transpose + zero-pad + bf16 cast of the activations.
    x_tm = jnp.swapaxes(x, 0, 1).astype(jnp.bfloat16)            # (T, N, D)
    x_p = (jnp.zeros((t, N_P, D_P), jnp.bfloat16)
           .at[:, :n, :d].set(x_tm)
           .reshape(t * N_P, D_P))

    # Whole problem (< 1 MiB resident) lives in VMEM; gridless single call —
    # a grid would only add ~0.35 us/step of pipeline overhead at these sizes.
    out_p = pl.pallas_call(
        rnn_kernel,
        out_shape=jax.ShapeDtypeStruct((t * N_P, K_P), jnp.float32),
        in_specs=[pl.BlockSpec(memory_space=pltpu.MemorySpace.VMEM)] * 6,
        out_specs=pl.BlockSpec(memory_space=pltpu.MemorySpace.VMEM),
        scratch_shapes=[pltpu.VMEM((t * N_P, M_P), jnp.float32)],  # xproj / h
    )(x_p, wih_p, whh_p, b_p, wfc_p, bfc_p)

    out_p = out_p.reshape(t, N_P, K_P)
    return jnp.swapaxes(out_p[:, :n, :K], 0, 1)                   # (N, T, K)


def simple_rnn_reference_f32(x, w_ih, w_hh, b_ih, b_hh, w_fc, b_fc):
    """Pure-JAX f32 reference matching torch nn.RNN(tanh, batch_first) + Linear."""
    def step(h, x_t):
        h = jnp.tanh(x_t @ w_ih.T + h @ w_hh.T + b_ih + b_hh)
        return h, h @ w_fc.T + b_fc
    h0 = jnp.zeros((x.shape[0], w_hh.shape[0]), jnp.float32)
    _, ys = lax.scan(step, h0, jnp.swapaxes(x, 0, 1))
    return jnp.swapaxes(ys, 0, 1)


def simple_rnn_reference_bf16(x, w_ih, w_hh, b_ih, b_hh, w_fc, b_fc):
    """Reference with the kernel's numerics: bf16 MXU operands, f32 accumulate/tanh."""
    bf = jnp.bfloat16
    wih_t = w_ih.T.astype(bf)
    whh_t = w_hh.T.astype(bf)
    wfc_t = w_fc.T.astype(bf)
    b = b_ih + b_hh

    def step(h, x_t):
        pre = (jnp.dot(x_t.astype(bf), wih_t, preferred_element_type=jnp.float32)
               + b
               + jnp.dot(h.astype(bf), whh_t, preferred_element_type=jnp.float32))
        h = jnp.tanh(pre)
        y = jnp.dot(h.astype(bf), wfc_t, preferred_element_type=jnp.float32) + b_fc
        return h, y

    h0 = jnp.zeros((x.shape[0], w_hh.shape[0]), jnp.float32)
    _, ys = lax.scan(step, h0, jnp.swapaxes(x, 0, 1))
    return jnp.swapaxes(ys, 0, 1)


if __name__ == "__main__":
    key = jax.random.PRNGKey(0)
    kx, k1, k2, k3, k4, k5, k6 = jax.random.split(key, 7)

    # Input, analogous to np.random.randn(N, T, D).astype(float32)
    x = jax.random.normal(kx, (N, T, D), dtype=jnp.float32)

    # Deterministic parameter init (PyTorch default: U(-1/sqrt(M), 1/sqrt(M)))
    bound = 1.0 / np.sqrt(M)
    w_ih = jax.random.uniform(k1, (M, D), jnp.float32, -bound, bound)
    w_hh = jax.random.uniform(k2, (M, M), jnp.float32, -bound, bound)
    b_ih = jax.random.uniform(k3, (M,), jnp.float32, -bound, bound)
    b_hh = jax.random.uniform(k4, (M,), jnp.float32, -bound, bound)
    w_fc = jax.random.uniform(k5, (K, M), jnp.float32, -bound, bound)
    b_fc = jax.random.uniform(k6, (K,), jnp.float32, -bound, bound)

    # Static parameter padding / cast happens once, outside the per-call path.
    params = prepare_params(w_ih, w_hh, b_ih, b_hh, w_fc, b_fc)

    out = simple_rnn_forward(x, *params)
    out = jax.block_until_ready(out)
    assert out.shape == (N, T, K), f"bad shape {out.shape}"

    # Tight check against a pure-JAX reference with the kernel's numerics
    # (bf16 MXU operands, f32 accumulation) -> validates the structure exactly.
    ref_bf16 = simple_rnn_reference_bf16(x, w_ih, w_hh, b_ih, b_hh, w_fc, b_fc)
    np.testing.assert_allclose(np.asarray(out), np.asarray(ref_bf16),
                               rtol=1e-3, atol=1e-3)

    # Loose check against the f32 spec semantics (bf16 operand rounding absorbed).
    ref_f32 = simple_rnn_reference_f32(x, w_ih, w_hh, b_ih, b_hh, w_fc, b_fc)
    np.testing.assert_allclose(np.asarray(out), np.asarray(ref_f32),
                               rtol=5e-2, atol=5e-2)

    print("KERNEL_OK")
</pallas_src>

<mosaic_0001>
module attributes {stable_mosaic.version = 11 : i64} {
  func.func @rnn_kernel(%arg0: memref<80x128xbf16, #tpu.memory_space<vmem>>, %arg1: memref<128x128xbf16, #tpu.memory_space<vmem>>, %arg2: memref<128x128xbf16, #tpu.memory_space<vmem>>, %arg3: memref<1x128xf32, #tpu.memory_space<vmem>>, %arg4: memref<128x128xbf16, #tpu.memory_space<vmem>>, %arg5: memref<1x128xf32, #tpu.memory_space<vmem>>, %arg6: memref<80x128xf32, #tpu.memory_space<vmem>>, %arg7: memref<80x128xf32, #tpu.memory_space<vmem>>) attributes {dimension_semantics = [], scalar_prefetch = 0 : i64, scratch_operands = 1 : i64, tpu.core_type = #tpu.core_type<tc>} {
    %c0 = arith.constant 0 : index
    %c0_0 = arith.constant 0 : index
    %0 = vector.load %arg0[%c0, %c0_0] : memref<80x128xbf16, #tpu.memory_space<vmem>>, vector<80x128xbf16>
    %c0_1 = arith.constant 0 : index
    %c0_2 = arith.constant 0 : index
    %1 = vector.load %arg1[%c0_1, %c0_2] : memref<128x128xbf16, #tpu.memory_space<vmem>>, vector<128x128xbf16>
    %cst = arith.constant dense<0.000000e+00> : vector<80x128xf32>
    %2 = tpu.matmul %0, %1, %cst {dimension_numbers = #tpu.dot_dimension_numbers<[1], [0], [0], [1], [0, 0, 1, 1], [], []>} : vector<80x128xbf16>, vector<128x128xbf16>, vector<80x128xf32> -> vector<80x128xf32>
    %c0_3 = arith.constant 0 : index
    %c0_4 = arith.constant 0 : index
    %3 = vector.load %arg3[%c0_3, %c0_4] : memref<1x128xf32, #tpu.memory_space<vmem>>, vector<1x128xf32>
    %4 = vector.broadcast %3 : vector<1x128xf32> to vector<80x128xf32>
    %5 = arith.addf %2, %4 : vector<80x128xf32>
    %c0_5 = arith.constant 0 : index
    %c0_6 = arith.constant 0 : index
    %6 = vector.load %arg7[%c0_5, %c0_6] : memref<80x128xf32, #tpu.memory_space<vmem>>, vector<80x128xf32>
    tpu.vector_store %arg7[%c0_5, %c0_6], %5 {strides = array<i32>} : memref<80x128xf32, #tpu.memory_space<vmem>>, vector<80x128xf32>,
    %c0_7 = arith.constant 0 : index
    %c0_8 = arith.constant 0 : index
    %7 = vector.load %arg2[%c0_7, %c0_8] : memref<128x128xbf16, #tpu.memory_space<vmem>>, vector<128x128xbf16>
    %cst_9 = arith.constant 0.000000e+00 : f32
    %8 = vector.broadcast %cst_9 : f32 to vector<8x128xf32>
    %c0_10 = arith.constant 0 : index
    %c0_11 = arith.constant 0 : index
    %9 = vector.load %arg7[%c0_10, %c0_11] : memref<80x128xf32, #tpu.memory_space<vmem>>, vector<8x128xf32>
    %10 = arith.truncf %8 : vector<8x128xf32> to vector<8x128xbf16>
    %cst_12 = arith.constant dense<0.000000e+00> : vector<8x128xf32>
    %11 = tpu.matmul %10, %7, %cst_12 {dimension_numbers = #tpu.dot_dimension_numbers<[1], [0], [0], [1], [0, 0, 1, 1], [], []>} : vector<8x128xbf16>, vector<128x128xbf16>, vector<8x128xf32> -> vector<8x128xf32>
    %12 = arith.addf %9, %11 : vector<8x128xf32>
    %13 = math.tanh %12 : vector<8x128xf32>
    %c0_13 = arith.constant 0 : index
    %c0_14 = arith.constant 0 : index
    %14 = vector.load %arg7[%c0_13, %c0_14] : memref<80x128xf32, #tpu.memory_space<vmem>>, vector<8x128xf32>
    tpu.vector_store %arg7[%c0_13, %c0_14], %13 {strides = array<i32>} : memref<80x128xf32, #tpu.memory_space<vmem>>, vector<8x128xf32>,
    %c8 = arith.constant 8 : index
    %c0_15 = arith.constant 0 : index
    %15 = vector.load %arg7[%c8, %c0_15] : memref<80x128xf32, #tpu.memory_space<vmem>>, vector<8x128xf32>
    %16 = arith.truncf %13 : vector<8x128xf32> to vector<8x128xbf16>
    %cst_16 = arith.constant dense<0.000000e+00> : vector<8x128xf32>
    %17 = tpu.matmul %16, %7, %cst_16 {dimension_numbers = #tpu.dot_dimension_numbers<[1], [0], [0], [1], [0, 0, 1, 1], [], []>} : vector<8x128xbf16>, vector<128x128xbf16>, vector<8x128xf32> -> vector<8x128xf32>
    %18 = arith.addf %15, %17 : vector<8x128xf32>
    %19 = math.tanh %18 : vector<8x128xf32>
    %c8_17 = arith.constant 8 : index
    %c0_18 = arith.constant 0 : index
    %20 = vector.load %arg7[%c8_17, %c0_18] : memref<80x128xf32, #tpu.memory_space<vmem>>, vector<8x128xf32>
    tpu.vector_store %arg7[%c8_17, %c0_18], %19 {strides = array<i32>} : memref<80x128xf32, #tpu.memory_space<vmem>>, vector<8x128xf32>,
    %c16 = arith.constant 16 : index
    %c0_19 = arith.constant 0 : index
    %21 = vector.load %arg7[%c16, %c0_19] : memref<80x128xf32, #tpu.memory_space<vmem>>, vector<8x128xf32>
    %22 = arith.truncf %19 : vector<8x128xf32> to vector<8x128xbf16>
    %cst_20 = arith.constant dense<0.000000e+00> : vector<8x128xf32>
    %23 = tpu.matmul %22, %7, %cst_20 {dimension_numbers = #tpu.dot_dimension_numbers<[1], [0], [0], [1], [0, 0, 1, 1], [], []>} : vector<8x128xbf16>, vector<128x128xbf16>, vector<8x128xf32> -> vector<8x128xf32>
    %24 = arith.addf %21, %23 : vector<8x128xf32>
    %25 = math.tanh %24 : vector<8x128xf32>
    %c16_21 = arith.constant 16 : index
    %c0_22 = arith.constant 0 : index
    %26 = vector.load %arg7[%c16_21, %c0_22] : memref<80x128xf32, #tpu.memory_space<vmem>>, vector<8x128xf32>
    tpu.vector_store %arg7[%c16_21, %c0_22], %25 {strides = array<i32>} : memref<80x128xf32, #tpu.memory_space<vmem>>, vector<8x128xf32>,
    %c24 = arith.constant 24 : index
    %c0_23 = arith.constant 0 : index
    %27 = vector.load %arg7[%c24, %c0_23] : memref<80x128xf32, #tpu.memory_space<vmem>>, vector<8x128xf32>
    %28 = arith.truncf %25 : vector<8x128xf32> to vector<8x128xbf16>
    %cst_24 = arith.constant dense<0.000000e+00> : vector<8x128xf32>
    %29 = tpu.matmul %28, %7, %cst_24 {dimension_numbers = #tpu.dot_dimension_numbers<[1], [0], [0], [1], [0, 0, 1, 1], [], []>} : vector<8x128xbf16>, vector<128x128xbf16>, vector<8x128xf32> -> vector<8x128xf32>
    %30 = arith.addf %27, %29 : vector<8x128xf32>
    %31 = math.tanh %30 : vector<8x128xf32>
    %c24_25 = arith.constant 24 : index
    %c0_26 = arith.constant 0 : index
    %32 = vector.load %arg7[%c24_25, %c0_26] : memref<80x128xf32, #tpu.memory_space<vmem>>, vector<8x128xf32>
    tpu.vector_store %arg7[%c24_25, %c0_26], %31 {strides = array<i32>} : memref<80x128xf32, #tpu.memory_space<vmem>>, vector<8x128xf32>,
    %c32 = arith.constant 32 : index
    %c0_27 = arith.constant 0 : index
    %33 = vector.load %arg7[%c32, %c0_27] : memref<80x128xf32, #tpu.memory_space<vmem>>, vector<8x128xf32>
    %34 = arith.truncf %31 : vector<8x128xf32> to vector<8x128xbf16>
    %cst_28 = arith.constant dense<0.000000e+00> : vector<8x128xf32>
    %35 = tpu.matmul %34, %7, %cst_28 {dimension_numbers = #tpu.dot_dimension_numbers<[1], [0], [0], [1], [0, 0, 1, 1], [], []>} : vector<8x128xbf16>, vector<128x128xbf16>, vector<8x128xf32> -> vector<8x128xf32>
    %36 = arith.addf %33, %35 : vector<8x128xf32>
    %37 = math.tanh %36 : vector<8x128xf32>
    %c32_29 = arith.constant 32 : index
    %c0_30 = arith.constant 0 : index
    %38 = vector.load %arg7[%c32_29, %c0_30] : memref<80x128xf32, #tpu.memory_space<vmem>>, vector<8x128xf32>
    tpu.vector_store %arg7[%c32_29, %c0_30], %37 {strides = array<i32>} : memref<80x128xf32, #tpu.memory_space<vmem>>, vector<8x128xf32>,
    %c40 = arith.constant 40 : index
    %c0_31 = arith.constant 0 : index
    %39 = vector.load %arg7[%c40, %c0_31] : memref<80x128xf32, #tpu.memory_space<vmem>>, vector<8x128xf32>
    %40 = arith.truncf %37 : vector<8x128xf32> to vector<8x128xbf16>
    %cst_32 = arith.constant dense<0.000000e+00> : vector<8x128xf32>
    %41 = tpu.matmul %40, %7, %cst_32 {dimension_numbers = #tpu.dot_dimension_numbers<[1], [0], [0], [1], [0, 0, 1, 1], [], []>} : vector<8x128xbf16>, vector<128x128xbf16>, vector<8x128xf32> -> vector<8x128xf32>
    %42 = arith.addf %39, %41 : vector<8x128xf32>
    %43 = math.tanh %42 : vector<8x128xf32>
    %c40_33 = arith.constant 40 : index
    %c0_34 = arith.constant 0 : index
    %44 = vector.load %arg7[%c40_33, %c0_34] : memref<80x128xf32, #tpu.memory_space<vmem>>, vector<8x128xf32>
    tpu.vector_store %arg7[%c40_33, %c0_34], %43 {strides = array<i32>} : memref<80x128xf32, #tpu.memory_space<vmem>>, vector<8x128xf32>,
    %c48 = arith.constant 48 : index
    %c0_35 = arith.constant 0 : index
    %45 = vector.load %arg7[%c48, %c0_35] : memref<80x128xf32, #tpu.memory_space<vmem>>, vector<8x128xf32>
    %46 = arith.truncf %43 : vector<8x128xf32> to vector<8x128xbf16>
    %cst_36 = arith.constant dense<0.000000e+00> : vector<8x128xf32>
    %47 = tpu.matmul %46, %7, %cst_36 {dimension_numbers = #tpu.dot_dimension_numbers<[1], [0], [0], [1], [0, 0, 1, 1], [], []>} : vector<8x128xbf16>, vector<128x128xbf16>, vector<8x128xf32> -> vector<8x128xf32>
    %48 = arith.addf %45, %47 : vector<8x128xf32>
    %49 = math.tanh %48 : vector<8x128xf32>
    %c48_37 = arith.constant 48 : index
    %c0_38 = arith.constant 0 : index
    %50 = vector.load %arg7[%c48_37, %c0_38] : memref<80x128xf32, #tpu.memory_space<vmem>>, vector<8x128xf32>
    tpu.vector_store %arg7[%c48_37, %c0_38], %49 {strides = array<i32>} : memref<80x128xf32, #tpu.memory_space<vmem>>, vector<8x128xf32>,
    %c56 = arith.constant 56 : index
    %c0_39 = arith.constant 0 : index
    %51 = vector.load %arg7[%c56, %c0_39] : memref<80x128xf32, #tpu.memory_space<vmem>>, vector<8x128xf32>
    %52 = arith.truncf %49 : vector<8x128xf32> to vector<8x128xbf16>
    %cst_40 = arith.constant dense<0.000000e+00> : vector<8x128xf32>
    %53 = tpu.matmul %52, %7, %cst_40 {dimension_numbers = #tpu.dot_dimension_numbers<[1], [0], [0], [1], [0, 0, 1, 1], [], []>} : vector<8x128xbf16>, vector<128x128xbf16>, vector<8x128xf32> -> vector<8x128xf32>
    %54 = arith.addf %51, %53 : vector<8x128xf32>
    %55 = math.tanh %54 : vector<8x128xf32>
    %c56_41 = arith.constant 56 : index
    %c0_42 = arith.constant 0 : index
    %56 = vector.load %arg7[%c56_41, %c0_42] : memref<80x128xf32, #tpu.memory_space<vmem>>, vector<8x128xf32>
    tpu.vector_store %arg7[%c56_41, %c0_42], %55 {strides = array<i32>} : memref<80x128xf32, #tpu.memory_space<vmem>>, vector<8x128xf32>,
    %c64 = arith.constant 64 : index
    %c0_43 = arith.constant 0 : index
    %57 = vector.load %arg7[%c64, %c0_43] : memref<80x128xf32, #tpu.memory_space<vmem>>, vector<8x128xf32>
    %58 = arith.truncf %55 : vector<8x128xf32> to vector<8x128xbf16>
    %cst_44 = arith.constant dense<0.000000e+00> : vector<8x128xf32>
    %59 = tpu.matmul %58, %7, %cst_44 {dimension_numbers = #tpu.dot_dimension_numbers<[1], [0], [0], [1], [0, 0, 1, 1], [], []>} : vector<8x128xbf16>, vector<128x128xbf16>, vector<8x128xf32> -> vector<8x128xf32>
    %60 = arith.addf %57, %59 : vector<8x128xf32>
    %61 = math.tanh %60 : vector<8x128xf32>
    %c64_45 = arith.constant 64 : index
    %c0_46 = arith.constant 0 : index
    %62 = vector.load %arg7[%c64_45, %c0_46] : memref<80x128xf32, #tpu.memory_space<vmem>>, vector<8x128xf32>
    tpu.vector_store %arg7[%c64_45, %c0_46], %61 {strides = array<i32>} : memref<80x128xf32, #tpu.memory_space<vmem>>, vector<8x128xf32>,
    %c72 = arith.constant 72 : index
    %c0_47 = arith.constant 0 : index
    %63 = vector.load %arg7[%c72, %c0_47] : memref<80x128xf32, #tpu.memory_space<vmem>>, vector<8x128xf32>
    %64 = arith.truncf %61 : vector<8x128xf32> to vector<8x128xbf16>
    %cst_48 = arith.constant dense<0.000000e+00> : vector<8x128xf32>
    %65 = tpu.matmul %64, %7, %cst_48 {dimension_numbers = #tpu.dot_dimension_numbers<[1], [0], [0], [1], [0, 0, 1, 1], [], []>} : vector<8x128xbf16>, vector<128x128xbf16>, vector<8x128xf32> -> vector<8x128xf32>
    %66 = arith.addf %63, %65 : vector<8x128xf32>
    %67 = math.tanh %66 : vector<8x128xf32>
    %c72_49 = arith.constant 72 : index
    %c0_50 = arith.constant 0 : index
    %68 = vector.load %arg7[%c72_49, %c0_50] : memref<80x128xf32, #tpu.memory_space<vmem>>, vector<8x128xf32>
    tpu.vector_store %arg7[%c72_49, %c0_50], %67 {strides = array<i32>} : memref<80x128xf32, #tpu.memory_space<vmem>>, vector<8x128xf32>,
    %c0_51 = arith.constant 0 : index
    %c0_52 = arith.constant 0 : index
    %69 = vector.load %arg7[%c0_51, %c0_52] : memref<80x128xf32, #tpu.memory_space<vmem>>, vector<80x128xf32>
    %70 = arith.truncf %69 : vector<80x128xf32> to vector<80x128xbf16>
    %c0_53 = arith.constant 0 : index
    %c0_54 = arith.constant 0 : index
    %71 = vector.load %arg4[%c0_53, %c0_54] : memref<128x128xbf16, #tpu.memory_space<vmem>>, vector<128x128xbf16>
    %cst_55 = arith.constant dense<0.000000e+00> : vector<80x128xf32>
    %72 = tpu.matmul %70, %71, %cst_55 {dimension_numbers = #tpu.dot_dimension_numbers<[1], [0], [0], [1], [0, 0, 1, 1], [], []>} : vector<80x128xbf16>, vector<128x128xbf16>, vector<80x128xf32> -> vector<80x128xf32>
    %c0_56 = arith.constant 0 : index
    %c0_57 = arith.constant 0 : index
    %73 = vector.load %arg5[%c0_56, %c0_57] : memref<1x128xf32, #tpu.memory_space<vmem>>, vector<1x128xf32>
    %74 = vector.broadcast %73 : vector<1x128xf32> to vector<80x128xf32>
    %75 = arith.addf %72, %74 : vector<80x128xf32>
    %c0_58 = arith.constant 0 : index
    %c0_59 = arith.constant 0 : index
    %76 = vector.load %arg6[%c0_58, %c0_59] : memref<80x128xf32, #tpu.memory_space<vmem>>, vector<80x128xf32>
    tpu.vector_store %arg6[%c0_58, %c0_59], %75 {strides = array<i32>} : memref<80x128xf32, #tpu.memory_space<vmem>>, vector<80x128xf32>,
    return
  }
}

</mosaic_0001>

<bundles_post_ra>
// kernel: simple_rnn_forward.1
= control target key start
LH: loop header
LB: loop body
LE: loop exit
PB: predicated region body
PF: predicated region fallthrough
CT: control target
= control target key end

     0   :  { %11 = vsyncpa [#allocation4], 0  ;;  %s1922_s0 = inlined_call_operand.vmem [shape: bf16[80,128], index: 0, kind: input, shape index: {}]   ;;  %s1923_s1 = inlined_call_operand.vmem [shape: bf16[128,128], index: 1, kind: input, shape index: {}]   ;;  %s1924_s2 = inlined_call_operand.hbm [shape: bf16[128,128], index: 2, kind: input, shape index: {}]   ;;  %s1925_s3 = inlined_call_operand.vmem [shape: f32[1,128], index: 3, kind: input, shape index: {}]   ;;  %s1926_s4 = inlined_call_operand.hbm [shape: bf16[128,128], index: 4, kind: input, shape index: {}]   ;;  %s1927_s5 = inlined_call_operand.vmem [shape: f32[1,128], index: 5, kind: input, shape index: {}]   ;;  %s1928_s6 = inlined_call_operand.vmem [shape: f32[80,128], index: 6, kind: output, shape index: {}]  }
   0x1   :  { %12 = vsyncpa [#allocation6], 0  ;;  %s1473_s21 = smov [#allocation3]   ;;  %s1425_s25 = scalar_lea.hbm %s1924_s2, 1024 }
   0x2   :  { %s22_s22 = sshll.u32 %s1473_s21, 4  ;;  %p1426_p0 = scmp.ne.s32.totalorder %s1924_s2, %s1425_s25  ;;  %s23_s22 = int_to_ptr.vmem [resolvable:$true] %s22_s22 }
   0x3   :  { %p1429_p1 = scmp.lt.u32.totalorder %s1425_s25, %s1924_s2 }
   0x5   :  { %p1431_p2 = pnand %p1429_p1, %p1426_p0 }
   0x7   :  { %1434 = shalt.err (!%p1431_p2)
}
   0x8   :  { %s1435_s30 = scalar_lea.vmem %s23_s22, 1024  ;;  %p1440_p4 = scmp.lt.s32.totalorder %s23_s22, %s23_s22 }
   0x9   :  { %p1436_p3 = scmp.ne.s32.totalorder %s23_s22, %s1435_s30  ;;  %p1441_p5 = scmp.lt.s32.totalorder %s1435_s30, %s1435_s30 }
   0xb   :  { %p1442_p6 = por %p1441_p5, %p1440_p4 }
   0xd   :  { %p1443_p7 = pnand %p1442_p6, %p1436_p3 }
   0xf   :  { %1446 = shalt.err (!%p1443_p7)
}
  0x10   :  { %s1474_s7 = smov 64   ;;  %s1475_s8 = smov 4  }
  0x11   :  { %28 = dma.hbm_to_vmem [thread:$0]  %s1924_s2, 1024, %s23_s22, [#allocation4], %s1474_s7, %s1474_s7, %s1475_s8  }
  0x12   :  { %s1476_s11 = smov [#allocation5]   ;;  %s1447_s15 = scalar_lea.hbm %s1926_s4, 1024 }
  0x13   :  { %s36_s12 = sshll.u32 %s1476_s11, 4  ;;  %p1448_p8 = scmp.ne.s32.totalorder %s1926_s4, %s1447_s15  ;;  %s37_s12 = int_to_ptr.vmem [resolvable:$true] %s36_s12 }
  0x14   :  { %p1451_p9 = scmp.lt.u32.totalorder %s1447_s15, %s1926_s4 }
  0x16   :  { %p1453_p10 = pnand %p1451_p9, %p1448_p8 }
  0x18   :  { %1456 = shalt.err (!%p1453_p10)
}
  0x19   :  { %s1457_s20 = scalar_lea.vmem %s37_s12, 1024  ;;  %p1462_p12 = scmp.lt.s32.totalorder %s37_s12, %s37_s12 }
  0x1a   :  { %p1458_p11 = scmp.ne.s32.totalorder %s37_s12, %s1457_s20  ;;  %p1463_p13 = scmp.lt.s32.totalorder %s1457_s20, %s1457_s20 }
  0x1c   :  { %p1464_p0 = por %p1463_p13, %p1462_p12 }
  0x1e   :  { %p1465_p1 = pnand %p1464_p0, %p1458_p11 }
  0x20   :  { %1468 = shalt.err (!%p1465_p1)
}
  0x21   :  { %42 = dma.hbm_to_vmem [thread:$0]  %s1926_s4, 1024, %s37_s12, [#allocation6], %s1474_s7, %s1474_s7, %s1475_s8  }
  0x22   :  { %1469 = dma.done.wait [#allocation4], 1024  }
  0x23   :  { %1470 = vsyncadd [#allocation4], 4294966272 }
  0x24   :  { %1471 = dma.done.wait [#allocation6], 1024  }
  0x25   :  { %1472 = vsyncadd [#allocation6], 4294966272  ;;  %v1477_v0 = vmov 0.0   ;;  %vm1478_vm0 = vmmov 0   ;;  %v1376_v1 = vld [vmem:[%s1923_s1] sm:$0xff]   ;;  %v1377_v2 = vld [vmem:[%s1923_s1 + $0x8] sm:$0xff]  }
  0x26   :  { %1353 = vmatprep.subr.bf16.mxu1 %v1477_v0  ;;  %1081 = vmatprep.subr.bf16.mxu0 %v1477_v0  ;;  %v1378_v3 = vld [vmem:[%s1923_s1 + $0x10] sm:$0xff]   ;;  %v1379_v4 = vld [vmem:[%s1923_s1 + $0x18] sm:$0xff]   ;;  %v1380_v5 = vld [vmem:[%s1923_s1 + $0x20] sm:$0xff]   ;;  %v1479_v19 = vmov 0  }
  0x27   :  { %1113 = vmatprep.mubr.msk.bf16.mxu1 %vm1478_vm0, %v1477_v0  ;;  %1097 = vmatprep.mubr.msk.bf16.mxu0 %vm1478_vm0, %v1477_v0  ;;  %v1381_v6 = vld [vmem:[%s1923_s1 + $0x28] sm:$0xff]   ;;  %v1382_v7 = vld [vmem:[%s1923_s1 + $0x30] sm:$0xff]   ;;  %v1383_v8 = vld [vmem:[%s1923_s1 + $0x38] sm:$0xff]  }
  0x28   :  { %1361 = vmatpush3.bf16.msra.mxu1 %v1376_v1  ;;  %1082 = vmatpush3.bf16.msra.mxu0 %v1376_v1  ;;  %v1384_v9 = vld [vmem:[%s1922_s0 + $0x20] sm:$0xff]   ;;  %v1594_v12 = vld [vmem:[#allocation3 + $0x8] sm:$0xff]   ;;  %v1604_v13 = vld [vmem:[#allocation3 + $0x10] sm:$0xff]  }
  0x29   :  { %1354 = vmatprep.subr.bf16.mxu1 %v1477_v0  ;;  %1083 = vmatprep.subr.bf16.mxu0 %v1477_v0  ;;  %v1392_v10 = vld [vmem:[%s1922_s0] sm:$0xff]   ;;  %v1610_v14 = vld [vmem:[#allocation3 + $0x18] sm:$0xff]   ;;  %v1622_v16 = vld [vmem:[#allocation3 + $0x28] sm:$0xff]  }
  0x2a   :  { %v1589_v11 = vld [vmem:[#allocation3] sm:$0xff]   ;;  %v1628_v17 = vld [vmem:[#allocation3 + $0x30] sm:$0xff]   ;;  %v1634_v18 = vld [vmem:[#allocation3 + $0x38] sm:$0xff]  }
  0x2b   :  { %v1616_v15 = vld [vmem:[#allocation3 + $0x20] sm:$0xff]   ;;  %v1394_v20 = vld [vmem:[%s1922_s0 + $0x8] sm:$0xff]   ;;  %v1395_v21 = vld [vmem:[%s1922_s0 + $0x10] sm:$0xff]  }
  0x2c   :  { %1362 = vmatpush3.bf16.msra.mxu1 %v1377_v2  ;;  %1084 = vmatpush3.bf16.msra.mxu0 %v1377_v2  ;;  %v1678_v30 = vld [vmem:[%s1925_s3] ss:$0 sm:$0xff]  ;;  %v1396_v39 = vld [vmem:[%s1922_s0 + $0x18] sm:$0xff]  }
  0x2d   :  { %1355 = vmatprep.subr.bf16.mxu1 %v1477_v0  ;;  %1085 = vmatprep.subr.bf16.mxu0 %v1477_v0 }
  0x30   :  { %1363 = vmatpush3.bf16.msra.mxu1 %v1378_v3  ;;  %1086 = vmatpush3.bf16.msra.mxu0 %v1378_v3 }
  0x31   :  { %1356 = vmatprep.subr.bf16.mxu1 %v1477_v0  ;;  %1087 = vmatprep.subr.bf16.mxu0 %v1477_v0 }
  0x34   :  { %1364 = vmatpush3.bf16.msra.mxu1 %v1379_v4  ;;  %1088 = vmatpush3.bf16.msra.mxu0 %v1379_v4 }
  0x35   :  { %1357 = vmatprep.subr.bf16.mxu1 %v1477_v0  ;;  %1089 = vmatprep.subr.bf16.mxu0 %v1477_v0 }
  0x38   :  { %1365 = vmatpush3.bf16.msra.mxu1 %v1380_v5  ;;  %1090 = vmatpush3.bf16.msra.mxu0 %v1380_v5 }
  0x39   :  { %1358 = vmatprep.subr.bf16.mxu1 %v1477_v0  ;;  %1091 = vmatprep.subr.bf16.mxu0 %v1477_v0 }
  0x3c   :  { %1366 = vmatpush3.bf16.msra.mxu1 %v1381_v6  ;;  %1092 = vmatpush3.bf16.msra.mxu0 %v1381_v6 }
  0x3d   :  { %1359 = vmatprep.subr.bf16.mxu1 %v1477_v0  ;;  %1093 = vmatprep.subr.bf16.mxu0 %v1477_v0 }
  0x40   :  { %1367 = vmatpush3.bf16.msra.mxu1 %v1382_v7  ;;  %1094 = vmatpush3.bf16.msra.mxu0 %v1382_v7 }
  0x41   :  { %1360 = vmatprep.subr.bf16.mxu1 %v1477_v0  ;;  %1095 = vmatprep.subr.bf16.mxu0 %v1477_v0 }
  0x44   :  { %1368 = vmatpush3.bf16.msra.mxu1 %v1383_v8  ;;  %1096 = vmatpush3.bf16.msra.mxu0 %v1383_v8 }
  0x45   :  { %1117 = vmatprep.subr.bf16.mxu1 %v1477_v0  ;;  %1157 = vmatprep.subr.bf16.mxu0 %v1477_v0 }
  0x47   :  { %1114 = vmatmul.mubr.bf16.vlgmr.msra.gmra.mrb[0].mxu1 %v1384_v9  ;;  %1098 = vmatmul.mubr.bf16.vlgmr.msra.gmra.mrb[0].mxu0 %v1392_v10 }
  0x48   :  { %1118 = vmatpush3.bf16.msra.mxu1 %v1589_v11  ;;  %1133 = vmatprep.mubr.msk.bf16.mxu1 %vm1478_vm0, %v1477_v0 }
  0x49   :  { %1119 = vmatprep.subr.bf16.mxu1 %v1477_v0  ;;  %1158 = vmatpush3.bf16.msra.mxu0 %v1589_v11 }
  0x4a   :  { %1159 = vmatprep.subr.bf16.mxu0 %v1477_v0  ;;  %1101 = vmatprep.mubr.msk.bf16.mxu0 %vm1478_vm0, %v1477_v0 }
  0x4c   :  { %1120 = vmatpush3.bf16.msra.mxu1 %v1594_v12 }
  0x4d   :  { %1121 = vmatprep.subr.bf16.mxu1 %v1477_v0  ;;  %1160 = vmatpush3.bf16.msra.mxu0 %v1594_v12 }
  0x4e   :  { %1161 = vmatprep.subr.bf16.mxu0 %v1477_v0 }
  0x4f   :  { %1102 = vmatmul.mubr.bf16.gmra.mrb[4].mxu0 %v1394_v20 }
  0x50   :  { %1122 = vmatpush3.bf16.msra.mxu1 %v1604_v13  ;;  %1105 = vmatprep.mubr.msk.bf16.mxu0 %vm1478_vm0, %v1477_v0 }
  0x51   :  { %1123 = vmatprep.subr.bf16.mxu1 %v1477_v0  ;;  %1162 = vmatpush3.bf16.msra.mxu0 %v1604_v13 }
  0x52   :  { %1163 = vmatprep.subr.bf16.mxu0 %v1477_v0 }
  0x54   :  { %1124 = vmatpush3.bf16.msra.mxu1 %v1610_v14 }
  0x55   :  { %1125 = vmatprep.subr.bf16.mxu1 %v1477_v0  ;;  %1164 = vmatpush3.bf16.msra.mxu0 %v1610_v14 }
  0x56   :  { %1165 = vmatprep.subr.bf16.mxu0 %v1477_v0 }
  0x57   :  { %1106 = vmatmul.mubr.bf16.gmra.mrb[8].mxu0 %v1395_v21 }
  0x58   :  { %1126 = vmatpush3.bf16.msra.mxu1 %v1616_v15  ;;  %1109 = vmatprep.mubr.msk.bf16.mxu0 %vm1478_vm0, %v1477_v0 }
  0x59   :  { %1127 = vmatprep.subr.bf16.mxu1 %v1477_v0  ;;  %1166 = vmatpush3.bf16.msra.mxu0 %v1616_v15 }
  0x5a   :  { %1167 = vmatprep.subr.bf16.mxu0 %v1477_v0 }
  0x5c   :  { %1128 = vmatpush3.bf16.msra.mxu1 %v1622_v16 }
  0x5d   :  { %1129 = vmatprep.subr.bf16.mxu1 %v1477_v0  ;;  %1168 = vmatpush3.bf16.msra.mxu0 %v1622_v16 }
  0x5e   :  { %1169 = vmatprep.subr.bf16.mxu0 %v1477_v0 }
  0x5f   :  { %1110 = vmatmul.mubr.bf16.gmra.mrb[12].mxu0 %v1396_v39 }
  0x60   :  { %1130 = vmatpush3.bf16.msra.mxu1 %v1628_v17  ;;  %1173 = vmatprep.mubr.msk.bf16.mxu0 %vm1478_vm0, %v1477_v0 }
  0x61   :  { %1131 = vmatprep.subr.bf16.mxu1 %v1477_v0  ;;  %1170 = vmatpush3.bf16.msra.mxu0 %v1628_v17 }
  0x62   :  { %1171 = vmatprep.subr.bf16.mxu0 %v1477_v0 }
  0x64   :  { %1132 = vmatpush3.bf16.msra.mxu1 %v1634_v18 }
  0x65   :  { %1137 = vmatprep.subr.bf16.mxu1 %v1477_v0  ;;  %1172 = vmatpush3.bf16.msra.mxu0 %v1634_v18 }
  0x66   :  { %1197 = vmatprep.subr.bf16.mxu0 %v1477_v0 }
  0x67   :  { %1134 = vmatmul.mubr.bf16.vlgmr.msra.gmra.mrb[4].mxu1 %v1479_v19 }
  0x68   :  { %1138 = vmatpush3.bf16.msra.mxu1 %v1589_v11  ;;  %1153 = vmatprep.mubr.msk.bf16.mxu1 %vm1478_vm0, %v1477_v0 }
  0x69   :  { %1139 = vmatprep.subr.bf16.mxu1 %v1477_v0 }
  0x6c   :  { %1140 = vmatpush3.bf16.msra.mxu1 %v1594_v12 }
  0x6d   :  { %1141 = vmatprep.subr.bf16.mxu1 %v1477_v0 }
  0x70   :  { %1142 = vmatpush3.bf16.msra.mxu1 %v1604_v13 }
  0x71   :  { %1143 = vmatprep.subr.bf16.mxu1 %v1477_v0 }
  0x74   :  { %1144 = vmatpush3.bf16.msra.mxu1 %v1610_v14 }
  0x75   :  { %1145 = vmatprep.subr.bf16.mxu1 %v1477_v0 }
  0x78   :  { %1146 = vmatpush3.bf16.msra.mxu1 %v1616_v15 }
  0x79   :  { %1147 = vmatprep.subr.bf16.mxu1 %v1477_v0 }
  0x7c   :  { %1148 = vmatpush3.bf16.msra.mxu1 %v1622_v16 }
  0x7d   :  { %1149 = vmatprep.subr.bf16.mxu1 %v1477_v0 }
  0x80   :  { %1150 = vmatpush3.bf16.msra.mxu1 %v1628_v17 }
  0x81   :  { %1151 = vmatprep.subr.bf16.mxu1 %v1477_v0 }
  0x84   :  { %1152 = vmatpush3.bf16.msra.mxu1 %v1634_v18 }
  0x85   :  { %1177 = vmatprep.subr.bf16.mxu1 %v1477_v0 }
 0x11a   :  { %v1671_v22 = vpop.f32.mrb[0].mxu1  ;;  %v197_v23 = vpop.f32.mrb[0].mxu0 }
 0x11b   :  { %v1115_v24 = vpop.f32.mrb[1].mxu1  ;;  %v1099_v25 = vpop.f32.mrb[1].mxu0  ;;  %v198_v31 = vadd.f32 %v1678_v30, %v197_v23 }
 0x11c   :  { %v1673_v26 = vpop.f32.mrb[2].mxu1  ;;  %v200_v27 = vpop.f32.mrb[2].mxu0 }
 0x11d   :  { %v1116_v28 = vpop.f32.mrb[3].mxu1  ;;  %v1100_v29 = vpop.f32.mrb[3].mxu0  ;;  %v201_v48 = vadd.f32 %v1678_v30, %v200_v27 }
 0x122   :  { %v205_v40 = vpop.f32.mrb[4].mxu0 }
 0x123   :  { %v1103_v41 = vpop.f32.mrb[5].mxu0  ;;  %v206_v60 = vadd.f32 %v1678_v30, %v205_v40 }
 0x124   :  { %v1708_v42 = vpop.f32.mrb[6].mxu0 }
 0x125   :  { %v1104_v43 = vpop.f32.mrb[7].mxu0  ;;  %v209_v5 = vadd.f32 %v1678_v30, %v1708_v42 }
 0x12a   :  { %v1710_v44 = vpop.f32.mrb[8].mxu0 }
 0x12b   :  { %v1107_v45 = vpop.f32.mrb[9].mxu0  ;;  %v214_v21 = vadd.f32 %v1678_v30, %v1710_v44 }
 0x12c   :  { %v1712_v46 = vpop.f32.mrb[10].mxu0 }
 0x12d   :  { %v1108_v47 = vpop.f32.mrb[11].mxu0 }
 0x132   :  { %v1737_v56 = vpop.f32.mrb[12].mxu0 }
 0x133   :  { %v1111_v57 = vpop.f32.mrb[13].mxu0  ;;  %v222_v41 = vadd.f32 %v1678_v30, %v1737_v56  ;;  %v1403_v56 = vld [vmem:[#allocation5 + $0x30] sm:$0xff]  }
 0x134   :  { %v1739_v58 = vpop.f32.mrb[14].mxu0  ;;  %v1404_v57 = vld [vmem:[#allocation5 + $0x38] sm:$0xff]  }
 0x135   :  { %v1112_v59 = vpop.f32.mrb[15].mxu0 }
 0x13a   :  { %v345_v32 = vpop.f32.mrb[4].mxu1 }
 0x13b   :  { %v351_v33 = vadd.f32 %v345_v32, %v198_v31  ;;  %v1135_v34 = vpop.f32.mrb[5].mxu1  ;;  %v217_v32 = vadd.f32 %v1678_v30, %v1712_v46 }
 0x13c   :  { %v348_v35 = vpop.f32.mrb[6].mxu1 }
 0x13d   :  { %1405 = vtanh.f32 %v351_v33  ;;  %v1136_v36 = vpop.f32.mrb[7].mxu1 }
 0x147   :  { %v1681_v37 = vpop.eup %1405 }
 0x148   :  { %v355_v38 = vpack.c.bf16 %v1681_v37, %v1681_v37 }
 0x14a   :  { %1154 = vmatmul.mubr.bf16.vlgmr.msra.gmra.mrb[8].mxu1 %v355_v38 }
 0x14b   :  { %1178 = vmatpush3.bf16.msra.mxu1 %v1589_v11  ;;  %1193 = vmatprep.mubr.msk.bf16.mxu1 %vm1478_vm0, %v1477_v0 }
 0x14c   :  { %1179 = vmatprep.subr.bf16.mxu1 %v1477_v0 }
 0x14f   :  { %1180 = vmatpush3.bf16.msra.mxu1 %v1594_v12 }
 0x150   :  { %1181 = vmatprep.subr.bf16.mxu1 %v1477_v0 }
 0x153   :  { %1182 = vmatpush3.bf16.msra.mxu1 %v1604_v13 }
 0x154   :  { %1183 = vmatprep.subr.bf16.mxu1 %v1477_v0 }
 0x157   :  { %1184 = vmatpush3.bf16.msra.mxu1 %v1610_v14 }
 0x158   :  { %1185 = vmatprep.subr.bf16.mxu1 %v1477_v0 }
 0x15b   :  { %1186 = vmatpush3.bf16.msra.mxu1 %v1616_v15 }
 0x15c   :  { %1187 = vmatprep.subr.bf16.mxu1 %v1477_v0 }
 0x15f   :  { %1188 = vmatpush3.bf16.msra.mxu1 %v1622_v16 }
 0x160   :  { %1189 = vmatprep.subr.bf16.mxu1 %v1477_v0 }
 0x163   :  { %1190 = vmatpush3.bf16.msra.mxu1 %v1628_v17 }
 0x164   :  { %1191 = vmatprep.subr.bf16.mxu1 %v1477_v0 }
 0x167   :  { %1192 = vmatpush3.bf16.msra.mxu1 %v1634_v18 }
 0x168   :  { %1217 = vmatprep.subr.bf16.mxu1 %v1477_v0 }
 0x21d   :  { %v390_v49 = vpop.f32.mrb[8].mxu1 }
 0x21e   :  { %v396_v50 = vadd.f32 %v390_v49, %v201_v48  ;;  %v1155_v51 = vpop.f32.mrb[9].mxu1 }
 0x21f   :  { %v393_v52 = vpop.f32.mrb[10].mxu1  ;;  %v1397_v51 = vld [vmem:[#allocation5] sm:$0xff]  }
 0x220   :  { %1407 = vtanh.f32 %v396_v50  ;;  %v1156_v53 = vpop.f32.mrb[11].mxu1  ;;  %v1398_v52 = vld [vmem:[#allocation5 + $0x8] sm:$0xff]  }
 0x221   :  { %v1401_v53 = vld [vmem:[#allocation5 + $0x20] sm:$0xff]  }
 0x22a   :  { %v1715_v54 = vpop.eup %1407 }
 0x22b   :  { %v400_v55 = vpack.c.bf16 %v1715_v54, %v1715_v54 }
 0x22d   :  { %1174 = vmatmul.mubr.bf16.vlgmr.msra.gmra.mrb[16].mxu0 %v400_v55  ;;  %v1402_v55 = vld [vmem:[#allocation5 + $0x28] sm:$0xff]  }
 0x22e   :  { %1198 = vmatpush3.bf16.msra.mxu0 %v1589_v11  ;;  %1213 = vmatprep.mubr.msk.bf16.mxu0 %vm1478_vm0, %v1477_v0 }
 0x22f   :  { %1199 = vmatprep.subr.bf16.mxu0 %v1477_v0 }
 0x232   :  { %1200 = vmatpush3.bf16.msra.mxu0 %v1594_v12 }
 0x233   :  { %1201 = vmatprep.subr.bf16.mxu0 %v1477_v0 }
 0x236   :  { %1202 = vmatpush3.bf16.msra.mxu0 %v1604_v13 }
 0x237   :  { %1203 = vmatprep.subr.bf16.mxu0 %v1477_v0 }
 0x23a   :  { %1204 = vmatpush3.bf16.msra.mxu0 %v1610_v14 }
 0x23b   :  { %1205 = vmatprep.subr.bf16.mxu0 %v1477_v0 }
 0x23e   :  { %1206 = vmatpush3.bf16.msra.mxu0 %v1616_v15 }
 0x23f   :  { %1207 = vmatprep.subr.bf16.mxu0 %v1477_v0 }
 0x242   :  { %1208 = vmatpush3.bf16.msra.mxu0 %v1622_v16 }
 0x243   :  { %1209 = vmatprep.subr.bf16.mxu0 %v1477_v0 }
 0x246   :  { %1210 = vmatpush3.bf16.msra.mxu0 %v1628_v17 }
 0x247   :  { %1211 = vmatprep.subr.bf16.mxu0 %v1477_v0 }
 0x24a   :  { %1212 = vmatpush3.bf16.msra.mxu0 %v1634_v18 }
 0x24b   :  { %1237 = vmatprep.subr.bf16.mxu0 %v1477_v0 }
 0x300   :  { %v435_v61 = vpop.f32.mrb[16].mxu0 }
 0x301   :  { %v441_v62 = vadd.f32 %v435_v61, %v206_v60  ;;  %v1175_v63 = vpop.f32.mrb[17].mxu0 }
 0x302   :  { %v438_v1 = vpop.f32.mrb[18].mxu0 }
 0x303   :  { %1409 = vtanh.f32 %v441_v62  ;;  %v1176_v2 = vpop.f32.mrb[19].mxu0 }
 0x30d   :  { %v1742_v3 = vpop.eup %1409 }
 0x30e   :  { %v445_v4 = vpack.c.bf16 %v1742_v3, %v1742_v3 }
 0x310   :  { %1194 = vmatmul.mubr.bf16.vlgmr.msra.gmra.mrb[12].mxu1 %v445_v4 }
 0x311   :  { %1218 = vmatpush3.bf16.msra.mxu1 %v1589_v11  ;;  %1233 = vmatprep.mubr.msk.bf16.mxu1 %vm1478_vm0, %v1477_v0 }
 0x312   :  { %1219 = vmatprep.subr.bf16.mxu1 %v1477_v0 }
 0x315   :  { %1220 = vmatpush3.bf16.msra.mxu1 %v1594_v12 }
 0x316   :  { %1221 = vmatprep.subr.bf16.mxu1 %v1477_v0 }
 0x319   :  { %1222 = vmatpush3.bf16.msra.mxu1 %v1604_v13 }
 0x31a   :  { %1223 = vmatprep.subr.bf16.mxu1 %v1477_v0 }
 0x31d   :  { %1224 = vmatpush3.bf16.msra.mxu1 %v1610_v14 }
 0x31e   :  { %1225 = vmatprep.subr.bf16.mxu1 %v1477_v0 }
 0x321   :  { %1226 = vmatpush3.bf16.msra.mxu1 %v1616_v15 }
 0x322   :  { %1227 = vmatprep.subr.bf16.mxu1 %v1477_v0 }
 0x325   :  { %1228 = vmatpush3.bf16.msra.mxu1 %v1622_v16 }
 0x326   :  { %1229 = vmatprep.subr.bf16.mxu1 %v1477_v0 }
 0x329   :  { %1230 = vmatpush3.bf16.msra.mxu1 %v1628_v17 }
 0x32a   :  { %1231 = vmatprep.subr.bf16.mxu1 %v1477_v0 }
 0x32d   :  { %1232 = vmatpush3.bf16.msra.mxu1 %v1634_v18 }
 0x32e   :  { %1257 = vmatprep.subr.bf16.mxu1 %v1477_v0 }
 0x3e3   :  { %v480_v6 = vpop.f32.mrb[12].mxu1 }
 0x3e4   :  { %v486_v7 = vadd.f32 %v480_v6, %v209_v5  ;;  %v1195_v8 = vpop.f32.mrb[13].mxu1  ;;  %v956_v5 = vld [vmem:[%s1927_s5] ss:$0 sm:$0xff] }
 0x3e5   :  { %v483_v9 = vpop.f32.mrb[14].mxu1 }
 0x3e6   :  { %1411 = vtanh.f32 %v486_v7  ;;  %v1196_v10 = vpop.f32.mrb[15].mxu1 }
 0x3f0   :  { %v1766_v19 = vpop.eup %1411 }
 0x3f1   :  { %v490_v20 = vpack.c.bf16 %v1766_v19, %v1766_v19  ;;  %v770_v59 = vpack.c.bf16 %v1766_v19, %v1742_v3 }
 0x3f3   :  { %1214 = vmatmul.mubr.bf16.vlgmr.msra.gmra.mrb[20].mxu0 %v490_v20 }
 0x3f4   :  { %1238 = vmatpush3.bf16.msra.mxu0 %v1589_v11  ;;  %1253 = vmatprep.mubr.msk.bf16.mxu0 %vm1478_vm0, %v1477_v0 }
 0x3f5   :  { %1239 = vmatprep.subr.bf16.mxu0 %v1477_v0 }
 0x3f8   :  { %1240 = vmatpush3.bf16.msra.mxu0 %v1594_v12 }
 0x3f9   :  { %1241 = vmatprep.subr.bf16.mxu0 %v1477_v0 }
 0x3fc   :  { %1242 = vmatpush3.bf16.msra.mxu0 %v1604_v13 }
 0x3fd   :  { %1243 = vmatprep.subr.bf16.mxu0 %v1477_v0 }
 0x400   :  { %1244 = vmatpush3.bf16.msra.mxu0 %v1610_v14 }
 0x401   :  { %1245 = vmatprep.subr.bf16.mxu0 %v1477_v0 }
 0x404   :  { %1246 = vmatpush3.bf16.msra.mxu0 %v1616_v15 }
 0x405   :  { %1247 = vmatprep.subr.bf16.mxu0 %v1477_v0 }
 0x408   :  { %1248 = vmatpush3.bf16.msra.mxu0 %v1622_v16 }
 0x409   :  { %1249 = vmatprep.subr.bf16.mxu0 %v1477_v0 }
 0x40c   :  { %1250 = vmatpush3.bf16.msra.mxu0 %v1628_v17 }
 0x40d   :  { %1251 = vmatprep.subr.bf16.mxu0 %v1477_v0 }
 0x410   :  { %1252 = vmatpush3.bf16.msra.mxu0 %v1634_v18 }
 0x411   :  { %1277 = vmatprep.subr.bf16.mxu0 %v1477_v0 }
 0x4c6   :  { %v525_v23 = vpop.f32.mrb[20].mxu0 }
 0x4c7   :  { %v531_v24 = vadd.f32 %v525_v23, %v214_v21  ;;  %v1215_v25 = vpop.f32.mrb[21].mxu0 }
 0x4c8   :  { %v528_v27 = vpop.f32.mrb[22].mxu0 }
 0x4c9   :  { %1413 = vtanh.f32 %v531_v24  ;;  %v1216_v28 = vpop.f32.mrb[23].mxu0 }
 0x4d3   :  { %v1790_v29 = vpop.eup %1413 }
 0x4d4   :  { %v535_v31 = vpack.c.bf16 %v1790_v29, %v1790_v29 }
 0x4d6   :  { %1234 = vmatmul.mubr.bf16.vlgmr.msra.gmra.mrb[16].mxu1 %v535_v31 }
 0x4d7   :  { %1258 = vmatpush3.bf16.msra.mxu1 %v1589_v11  ;;  %1273 = vmatprep.mubr.msk.bf16.mxu1 %vm1478_vm0, %v1477_v0 }
 0x4d8   :  { %1259 = vmatprep.subr.bf16.mxu1 %v1477_v0 }
 0x4db   :  { %1260 = vmatpush3.bf16.msra.mxu1 %v1594_v12 }
 0x4dc   :  { %1261 = vmatprep.subr.bf16.mxu1 %v1477_v0 }
 0x4df   :  { %1262 = vmatpush3.bf16.msra.mxu1 %v1604_v13 }
 0x4e0   :  { %1263 = vmatprep.subr.bf16.mxu1 %v1477_v0 }
 0x4e3   :  { %1264 = vmatpush3.bf16.msra.mxu1 %v1610_v14 }
 0x4e4   :  { %1265 = vmatprep.subr.bf16.mxu1 %v1477_v0 }
 0x4e7   :  { %1266 = vmatpush3.bf16.msra.mxu1 %v1616_v15 }
 0x4e8   :  { %1267 = vmatprep.subr.bf16.mxu1 %v1477_v0 }
 0x4eb   :  { %1268 = vmatpush3.bf16.msra.mxu1 %v1622_v16 }
 0x4ec   :  { %1269 = vmatprep.subr.bf16.mxu1 %v1477_v0 }
 0x4ef   :  { %1270 = vmatpush3.bf16.msra.mxu1 %v1628_v17 }
 0x4f0   :  { %1271 = vmatprep.subr.bf16.mxu1 %v1477_v0 }
 0x4f3   :  { %1272 = vmatpush3.bf16.msra.mxu1 %v1634_v18 }
 0x4f4   :  { %1297 = vmatprep.subr.bf16.mxu1 %v1477_v0 }
 0x5a9   :  { %v570_v33 = vpop.f32.mrb[16].mxu1 }
 0x5aa   :  { %v576_v34 = vadd.f32 %v570_v33, %v217_v32  ;;  %v1235_v35 = vpop.f32.mrb[17].mxu1 }
 0x5ab   :  { %v573_v36 = vpop.f32.mrb[18].mxu1 }
 0x5ac   :  { %1415 = vtanh.f32 %v576_v34  ;;  %v1236_v38 = vpop.f32.mrb[19].mxu1 }
 0x5b6   :  { %v1814_v39 = vpop.eup %1415 }
 0x5b7   :  { %v580_v40 = vpack.c.bf16 %v1814_v39, %v1814_v39  ;;  %v771_v60 = vpack.c.bf16 %v1814_v39, %v1790_v29 }
 0x5b9   :  { %1254 = vmatmul.mubr.bf16.vlgmr.msra.gmra.mrb[24].mxu0 %v580_v40  ;;  %v233_v40 = vadd.f32 %v1678_v30, %v1673_v26 }
 0x5ba   :  { %1278 = vmatpush3.bf16.msra.mxu0 %v1589_v11  ;;  %1293 = vmatprep.mubr.msk.bf16.mxu0 %vm1478_vm0, %v1477_v0 }
 0x5bb   :  { %1279 = vmatprep.subr.bf16.mxu0 %v1477_v0 }
 0x5be   :  { %1280 = vmatpush3.bf16.msra.mxu0 %v1594_v12 }
 0x5bf   :  { %1281 = vmatprep.subr.bf16.mxu0 %v1477_v0 }
 0x5c2   :  { %1282 = vmatpush3.bf16.msra.mxu0 %v1604_v13 }
 0x5c3   :  { %1283 = vmatprep.subr.bf16.mxu0 %v1477_v0 }
 0x5c6   :  { %1284 = vmatpush3.bf16.msra.mxu0 %v1610_v14 }
 0x5c7   :  { %1285 = vmatprep.subr.bf16.mxu0 %v1477_v0 }
 0x5ca   :  { %1286 = vmatpush3.bf16.msra.mxu0 %v1616_v15 }
 0x5cb   :  { %1287 = vmatprep.subr.bf16.mxu0 %v1477_v0 }
 0x5ce   :  { %1288 = vmatpush3.bf16.msra.mxu0 %v1622_v16 }
 0x5cf   :  { %1289 = vmatprep.subr.bf16.mxu0 %v1477_v0 }
 0x5d2   :  { %1290 = vmatpush3.bf16.msra.mxu0 %v1628_v17 }
 0x5d3   :  { %1291 = vmatprep.subr.bf16.mxu0 %v1477_v0 }
 0x5d6   :  { %1292 = vmatpush3.bf16.msra.mxu0 %v1634_v18 }
 0x5d7   :  { %1317 = vmatprep.subr.bf16.mxu0 %v1477_v0 }
 0x68c   :  { %v615_v42 = vpop.f32.mrb[24].mxu0 }
 0x68d   :  { %v621_v43 = vadd.f32 %v615_v42, %v222_v41  ;;  %v1255_v44 = vpop.f32.mrb[25].mxu0 }
 0x68e   :  { %v618_v45 = vpop.f32.mrb[26].mxu0 }
 0x68f   :  { %1417 = vtanh.f32 %v621_v43  ;;  %v1256_v46 = vpop.f32.mrb[27].mxu0 }
 0x699   :  { %v1838_v47 = vpop.eup %1417 }
 0x69a   :  { %v625_v48 = vpack.c.bf16 %v1838_v47, %v1838_v47 }
 0x69c   :  { %1274 = vmatmul.mubr.bf16.vlgmr.msra.gmra.mrb[20].mxu1 %v625_v48 }
 0x69d   :  { %1298 = vmatpush3.bf16.msra.mxu1 %v1589_v11  ;;  %1313 = vmatprep.mubr.msk.bf16.mxu1 %vm1478_vm0, %v1477_v0  ;;  %v225_v11 = vadd.f32 %v1678_v30, %v1739_v58  ;;  %v769_v58 = vpack.c.bf16 %v1715_v54, %v1681_v37  ;;  %v230_v54 = vadd.f32 %v1678_v30, %v1671_v22 }
 0x69e   :  { %1299 = vmatprep.subr.bf16.mxu1 %v1477_v0 }
 0x6a1   :  { %1300 = vmatpush3.bf16.msra.mxu1 %v1594_v12 }
 0x6a2   :  { %1301 = vmatprep.subr.bf16.mxu1 %v1477_v0 }
 0x6a5   :  { %1302 = vmatpush3.bf16.msra.mxu1 %v1604_v13 }
 0x6a6   :  { %1303 = vmatprep.subr.bf16.mxu1 %v1477_v0 }
 0x6a9   :  { %1304 = vmatpush3.bf16.msra.mxu1 %v1610_v14 }
 0x6aa   :  { %1305 = vmatprep.subr.bf16.mxu1 %v1477_v0 }
 0x6ad   :  { %1306 = vmatpush3.bf16.msra.mxu1 %v1616_v15 }
 0x6ae   :  { %1307 = vmatprep.subr.bf16.mxu1 %v1477_v0 }
 0x6b1   :  { %1308 = vmatpush3.bf16.msra.mxu1 %v1622_v16 }
 0x6b2   :  { %1309 = vmatprep.subr.bf16.mxu1 %v1477_v0 }
 0x6b5   :  { %1310 = vmatpush3.bf16.msra.mxu1 %v1628_v17  ;;  %v1399_v17 = vld [vmem:[#allocation5 + $0x10] sm:$0xff]  }
 0x6b6   :  { %1311 = vmatprep.subr.bf16.mxu1 %v1477_v0 }
 0x6b9   :  { %1312 = vmatpush3.bf16.msra.mxu1 %v1634_v18  ;;  %v1400_v18 = vld [vmem:[#allocation5 + $0x18] sm:$0xff]  }
 0x76f   :  { %v660_v12 = vpop.f32.mrb[20].mxu1 }
 0x770   :  { %v666_v13 = vadd.f32 %v660_v12, %v225_v11  ;;  %v1275_v14 = vpop.f32.mrb[21].mxu1 }
 0x771   :  { %v663_v49 = vpop.f32.mrb[22].mxu1 }
 0x772   :  { %1419 = vtanh.f32 %v666_v13  ;;  %v1276_v15 = vpop.f32.mrb[23].mxu1 }
 0x77c   :  { %v1420_v50 = vpop.eup %1419 }
 0x77d   :  { %v670_v16 = vpack.c.bf16 %v1420_v50, %v1420_v50  ;;  %v772_v37 = vpack.c.bf16 %v1420_v50, %v1838_v47 }
 0x77f   :  { %1294 = vmatmul.mubr.bf16.vlgmr.msra.gmra.mrb[28].mxu0 %v670_v16 }
 0x780   :  { %1318 = vmatpush3.bf16.msra.mxu0 %v1397_v51  ;;  %1333 = vmatprep.mubr.msk.bf16.mxu0 %vm1478_vm0, %v1477_v0 }
 0x781   :  { %1319 = vmatprep.subr.bf16.mxu0 %v1477_v0 }
 0x784   :  { %1320 = vmatpush3.bf16.msra.mxu0 %v1398_v52 }
 0x785   :  { %1321 = vmatprep.subr.bf16.mxu0 %v1477_v0 }
 0x788   :  { %1322 = vmatpush3.bf16.msra.mxu0 %v1399_v17 }
 0x789   :  { %1323 = vmatprep.subr.bf16.mxu0 %v1477_v0 }
 0x78c   :  { %1324 = vmatpush3.bf16.msra.mxu0 %v1400_v18 }
 0x78d   :  { %1325 = vmatprep.subr.bf16.mxu0 %v1477_v0 }
 0x790   :  { %1326 = vmatpush3.bf16.msra.mxu0 %v1401_v53 }
 0x791   :  { %1327 = vmatprep.subr.bf16.mxu0 %v1477_v0 }
 0x794   :  { %1328 = vmatpush3.bf16.msra.mxu0 %v1402_v55 }
 0x795   :  { %1329 = vmatprep.subr.bf16.mxu0 %v1477_v0 }
 0x798   :  { %1330 = vmatpush3.bf16.msra.mxu0 %v1403_v56 }
 0x799   :  { %1331 = vmatprep.subr.bf16.mxu0 %v1477_v0 }
 0x79c   :  { %1332 = vmatpush3.bf16.msra.mxu0 %v1404_v57 }
 0x79f   :  { %1334 = vmatmul.mubr.bf16.vlgmr.msra.gmra.mrb[32].mxu0 %v769_v58 }
 0x7a0   :  { %1337 = vmatprep.mubr.msk.bf16.mxu0 %vm1478_vm0, %v1477_v0 }
 0x7a7   :  { %1338 = vmatmul.mubr.bf16.gmra.mrb[36].mxu0 %v770_v59 }
 0x7a8   :  { %1341 = vmatprep.mubr.msk.bf16.mxu0 %vm1478_vm0, %v1477_v0 }
 0x7af   :  { %1342 = vmatmul.mubr.bf16.gmra.mrb[40].mxu0 %v771_v60 }
 0x7b0   :  { %1345 = vmatprep.mubr.msk.bf16.mxu0 %vm1478_vm0, %v1477_v0 }
 0x7b7   :  { %1346 = vmatmul.mubr.bf16.gmra.mrb[44].mxu0 %v772_v37 }
 0x7b8   :  { %1349 = vmatprep.mubr.msk.bf16.mxu0 %vm1478_vm0, %v1477_v0 }
 0x852   :  { %v705_v61 = vpop.f32.mrb[28].mxu0 }
 0x853   :  { %v711_v62 = vadd.f32 %v705_v61, %v230_v54  ;;  %v1295_v63 = vpop.f32.mrb[29].mxu0 }
 0x854   :  { %v708_v1 = vpop.f32.mrb[30].mxu0 }
 0x855   :  { %1421 = vtanh.f32 %v711_v62  ;;  %v1296_v2 = vpop.f32.mrb[31].mxu0 }
 0x85f   :  { %v1422_v3 = vpop.eup %1421 }
 0x860   :  { %v715_v4 = vpack.c.bf16 %v1422_v3, %v1422_v3 }
 0x862   :  { %1314 = vmatmul.mubr.bf16.vlgmr.msra.gmra.mrb[24].mxu1 %v715_v4 }
 0x872   :  { %v879_v6 = vpop.f32.mrb[32].mxu0 }
 0x873   :  { %v880_v7 = vadd.f32 %v956_v5, %v879_v6  ;;  %v1335_v8 = vpop.f32.mrb[33].mxu0 }
 0x874   :  { %v882_v0 = vpop.f32.mrb[34].mxu0 }
 0x875   :  { %918 = vst [vmem:[%s1928_s6] sm:$0xff] %v880_v7  ;;  %v883_v22 = vadd.f32 %v956_v5, %v882_v0  ;;  %v1336_v9 = vpop.f32.mrb[35].mxu0 }
 0x877   :  { %919 = vst [vmem:[%s1928_s6 + $0x8] sm:$0xff] %v883_v22 }
 0x87a   :  { %v887_v10 = vpop.f32.mrb[36].mxu0 }
 0x87b   :  { %v888_v19 = vadd.f32 %v956_v5, %v887_v10  ;;  %v1339_v20 = vpop.f32.mrb[37].mxu0 }
 0x87c   :  { %v890_v21 = vpop.f32.mrb[38].mxu0 }
 0x87d   :  { %920 = vst [vmem:[%s1928_s6 + $0x10] sm:$0xff] %v888_v19  ;;  %v891_v23 = vadd.f32 %v956_v5, %v890_v21  ;;  %v1340_v24 = vpop.f32.mrb[39].mxu0 }
 0x87f   :  { %921 = vst [vmem:[%s1928_s6 + $0x18] sm:$0xff] %v891_v23 }
 0x882   :  { %v895_v25 = vpop.f32.mrb[40].mxu0 }
 0x883   :  { %v896_v27 = vadd.f32 %v956_v5, %v895_v25  ;;  %v1343_v28 = vpop.f32.mrb[41].mxu0 }
 0x884   :  { %v898_v29 = vpop.f32.mrb[42].mxu0 }
 0x885   :  { %922 = vst [vmem:[%s1928_s6 + $0x20] sm:$0xff] %v896_v27  ;;  %v899_v31 = vadd.f32 %v956_v5, %v898_v29  ;;  %v1344_v32 = vpop.f32.mrb[43].mxu0 }
 0x887   :  { %923 = vst [vmem:[%s1928_s6 + $0x28] sm:$0xff] %v899_v31 }
 0x88a   :  { %v903_v33 = vpop.f32.mrb[44].mxu0 }
 0x88b   :  { %v904_v34 = vadd.f32 %v956_v5, %v903_v33  ;;  %v1347_v35 = vpop.f32.mrb[45].mxu0 }
 0x88c   :  { %v906_v36 = vpop.f32.mrb[46].mxu0 }
 0x88d   :  { %924 = vst [vmem:[%s1928_s6 + $0x30] sm:$0xff] %v904_v34  ;;  %v907_v38 = vadd.f32 %v956_v5, %v906_v36  ;;  %v1348_v39 = vpop.f32.mrb[47].mxu0 }
 0x88f   :  { %925 = vst [vmem:[%s1928_s6 + $0x38] sm:$0xff] %v907_v38 }
 0x935   :  { %v750_v41 = vpop.f32.mrb[24].mxu1 }
 0x936   :  { %v756_v42 = vadd.f32 %v750_v41, %v233_v40  ;;  %v1315_v43 = vpop.f32.mrb[25].mxu1 }
 0x937   :  { %v753_v44 = vpop.f32.mrb[26].mxu1 }
 0x938   :  { %1423 = vtanh.f32 %v756_v42  ;;  %v1316_v45 = vpop.f32.mrb[27].mxu1 }
 0x942   :  { %v1424_v46 = vpop.eup %1423 }
 0x943   :  { %v773_v47 = vpack.c.bf16 %v1424_v46, %v1422_v3 }
 0x945   :  { %1350 = vmatmul.mubr.bf16.gmra.mrb[48].mxu0 %v773_v47 }
 0xa18   :  { %v911_v48 = vpop.f32.mrb[48].mxu0 }
 0xa19   :  { %v912_v11 = vadd.f32 %v956_v5, %v911_v48  ;;  %v1351_v12 = vpop.f32.mrb[49].mxu0 }
 0xa1a   :  { %v914_v13 = vpop.f32.mrb[50].mxu0 }
 0xa1b   :  { %926 = vst [vmem:[%s1928_s6 + $0x40] sm:$0xff] %v912_v11  ;;  %v915_v14 = vadd.f32 %v956_v5, %v914_v13  ;;  %v1352_v49 = vpop.f32.mrb[51].mxu0 }
 0xa1d   :  { %927 = vst [vmem:[%s1928_s6 + $0x48] sm:$0xff] %v915_v14 }
 0xa1e   :  { %932 = vsyncpa [#allocation4], 1 }
 0xa1f   :  { %933 = vsyncpa [#allocation6], 1 }

</bundles_post_ra>
